<compile_context>
chip_gen: v7x
topology: tpu7x:2x2x1
jax: 0.10.0
libtpu: 0.0.40
codegen_flags: <defaults>
</compile_context>

<pallas_src>
import functools

import jax
import jax.numpy as jnp
from jax.experimental import pallas as pl
from jax.experimental.pallas import tpu as pltpu

_LANE = 128


def _ptmodule_kernel(x_ref, o_ref):
    # Elementwise sqrt(2x + 7); compute in f32, store in the output dtype.
    x = x_ref[...].astype(jnp.float32)
    o_ref[...] = jnp.sqrt(2.0 * x + 7.0).astype(o_ref.dtype)


def _plan_layout(total):
    """Pick (width, rows, pad) for a lane-dense 2-D slab of `total` elements.

    Prefers a wide last dim (long DMA bursts, unmasked wide stores) with zero
    padding and rows a multiple of 8 sublanes. Falls back to padding only for
    awkward sizes.
    """
    for width in (8192, 4096, 2048, 1024, 512, 256, 128):
        if total % width == 0:
            rows = total // width
            if rows % 8 == 0:
                return width, rows, 0
    # Fallback: pad up to a multiple of (8, width).
    width = 1024 if total >= 1024 else _LANE
    rows = -(-total // width)
    rows = -(-rows // 8) * 8
    return width, rows, rows * width - total


def _pick_block_rows(rows, width, itemsize):
    """Largest block-row count that (a) is a multiple of 8, (b) divides rows,
    (c) keeps one block around ~2 MiB (so double-buffered in+out stays far
    under the scoped VMEM limit on every chip generation)."""
    target_bytes = 2 * 1024 * 1024
    max_br = max(8, target_bytes // max(1, width * itemsize))
    max_br = (max_br // 8) * 8
    br = min(rows, max_br)
    while br > 8 and rows % br != 0:
        br -= 8
    if rows % br != 0:
        br = 8  # rows is always a multiple of 8 by construction
    return br


@functools.partial(jax.jit)
def ptmodule_forward(x):
    """x: float array (any shape, e.g. NCHW). Returns sqrt(2x + 7) elementwise
    with the same shape/dtype as the input (matches PtModule.forward)."""
    orig_shape = x.shape
    dtype = x.dtype
    total = x.size

    width, rows, pad = _plan_layout(total)

    x_flat = jnp.ravel(x)
    if pad:
        # Rare fallback path (awkward sizes only). sqrt(2*0 + 7) on padding is
        # finite and harmless; padded values are discarded below.
        x_flat = jnp.pad(x_flat, (0, pad))
    x2d = x_flat.reshape(rows, width)

    br = _pick_block_rows(rows, width, dtype.itemsize)
    grid = (rows // br,)

    out2d = pl.pallas_call(
        _ptmodule_kernel,
        out_shape=jax.ShapeDtypeStruct((rows, width), dtype),
        grid=grid,
        in_specs=[pl.BlockSpec((br, width), lambda i: (i, 0))],
        out_specs=pl.BlockSpec((br, width), lambda i: (i, 0)),
        compiler_params=pltpu.CompilerParams(
            dimension_semantics=("parallel",),
        ),
    )(x2d)

    if pad:
        out = out2d.reshape(-1)[:total].reshape(orig_shape)
    else:
        out = out2d.reshape(orig_shape)
    return out


if __name__ == "__main__":
    key = jax.random.PRNGKey(0)
    # Small NCHW-like input consistent with the module's generic forward.
    x = jax.random.uniform(key, (2, 4, 16, 16), dtype=jnp.float32,
                           minval=0.0, maxval=1.0)

    out = ptmodule_forward(x)
    out = jax.block_until_ready(out)

    # Reference check in plain JAX.
    ref = jnp.sqrt((x + 5.0) * 2.0 - 3.0)
    assert out.shape == x.shape
    assert out.dtype == x.dtype
    assert jnp.allclose(out, ref, atol=1e-5, rtol=1e-5)

    print("KERNEL_OK")
</pallas_src>

<mosaic_0001>
module attributes {stable_mosaic.version = 11 : i64} {
  func.func @_ptmodule_kernel(%arg0: i32, %arg1: memref<8x256xf32, #tpu.memory_space<vmem>>, %arg2: memref<8x256xf32, #tpu.memory_space<vmem>>) attributes {dimension_semantics = [#tpu.dimension_semantics<parallel>], iteration_bounds = array<i64: 1>, scalar_prefetch = 0 : i64, scratch_operands = 0 : i64, tpu.core_type = #tpu.core_type<tc>, window_params = [{transform_indices = @transform_0, window_bounds = array<i64: 8, 256>}, {transform_indices = @transform_1, window_bounds = array<i64: 8, 256>}]} {
    %c0 = arith.constant 0 : index
    %c0_0 = arith.constant 0 : index
    %0 = vector.load %arg1[%c0, %c0_0] : memref<8x256xf32, #tpu.memory_space<vmem>>, vector<8x256xf32>
    %cst = arith.constant 2.000000e+00 : f32
    %1 = vector.broadcast %cst : f32 to vector<8x256xf32>
    %2 = arith.mulf %1, %0 : vector<8x256xf32>
    %cst_1 = arith.constant 7.000000e+00 : f32
    %3 = vector.broadcast %cst_1 : f32 to vector<8x256xf32>
    %4 = arith.addf %2, %3 : vector<8x256xf32>
    %5 = math.sqrt %4 : vector<8x256xf32>
    %c0_2 = arith.constant 0 : index
    %c0_3 = arith.constant 0 : index
    %6 = vector.load %arg2[%c0_2, %c0_3] : memref<8x256xf32, #tpu.memory_space<vmem>>, vector<8x256xf32>
    tpu.vector_store %arg2[%c0_2, %c0_3], %5 {strides = array<i32>} : memref<8x256xf32, #tpu.memory_space<vmem>>, vector<8x256xf32>,
    return
  }
  func.func @transform_0(%arg0: i32) -> (i32, i32) {
    %c0_i32 = arith.constant 0 : i32
    %c0_i32_0 = arith.constant 0 : i32
    return %arg0, %c0_i32 : i32, i32
  }
  func.func @transform_1(%arg0: i32) -> (i32, i32) {
    %c0_i32 = arith.constant 0 : i32
    %c0_i32_0 = arith.constant 0 : i32
    return %arg0, %c0_i32 : i32, i32
  }
}

</mosaic_0001>

<bundles_post_ra>
// kernel: ptmodule_forward.1
= control target key start
LH: loop header
LB: loop body
LE: loop exit
PB: predicated region body
PF: predicated region fallthrough
CT: control target
= control target key end

     0   :  { %s60_s0 = inlined_call_operand.vmem [shape: f32[8,256], index: 0, kind: input, shape index: {}]   ;;  %s61_s1 = inlined_call_operand.vmem [shape: f32[8,256], index: 1, kind: output, shape index: {}]  }
   0x1   :  { %v8_v0 = vld [vmem:[%s60_s0] sm:$0xff]  ;;  %v9_v1 = vld [vmem:[%s60_s0 + $0x8] sm:$0xff] }
   0x2   :  { %v10_v2 = vmul.f32 2.0, %v8_v0  ;;  %v11_v3 = vmul.f32 2.0, %v9_v1 }
   0x4   :  { %v12_v4 = vadd.f32 7.0, %v10_v2  ;;  %v13_v5 = vadd.f32 7.0, %v11_v3 }
   0x6   :  { %34 = vrsqrt.f32 %v12_v4  ;;  %vm16_vm0 = vcmp.eq.f32.partialorder %v12_v4, inf  ;;  %v19_v7 = vand.u32 2147483648, %v12_v4  ;;  %vm18_vm1 = vcmp.eq.f32.partialorder %v12_v4, 0.0 }
   0x7   :  { %36 = vrsqrt.f32 %v13_v5  ;;  %vm23_vm2 = vcmp.eq.f32.partialorder %v13_v5, inf  ;;  %v26_v10 = vand.u32 2147483648, %v13_v5  ;;  %vm25_vm3 = vcmp.eq.f32.partialorder %v13_v5, 0.0 }
  0x10   :  { %v35_v6 = vpop.eup %34 }
  0x11   :  { %v37_v8 = vpop.eup %36  ;;  %v15_v9 = vmul.f32 %v35_v6, %v12_v4 }
  0x12   :  { %v22_v11 = vmul.f32 %v37_v8, %v13_v5 }
  0x13   :  { %v17_v12 = vsel %vm16_vm0, %v12_v4, %v15_v9 }
  0x14   :  { %v20_v13 = vsel %vm18_vm1, %v19_v7, %v17_v12  ;;  %v24_v14 = vsel %vm23_vm2, %v13_v5, %v22_v11 }
  0x15   :  { %28 = vst [vmem:[%s61_s1] sm:$0xff] %v20_v13  ;;  %v27_v15 = vsel %vm25_vm3, %v26_v10, %v24_v14 }
  0x16   :  { %29 = vst [vmem:[%s61_s1 + $0x8] sm:$0xff] %v27_v15 }

</bundles_post_ra>
